<compile_context>
chip_gen: v7x
topology: tpu7x:2x2x1
jax: 0.10.0
libtpu: 0.0.40
codegen_flags: <defaults>
</compile_context>

<pallas_src>
import jax
import jax.numpy as jnp
from jax.experimental import pallas as pl
from jax.experimental.pallas import tpu as pltpu


_MAX_TILE_B = 16384   # rows per grid step (lane axis), multiple of 128
_LANE_CHUNK = 2048    # inner compute chunk, keeps live vregs small


def _round_up(n, m):
    return ((n + m - 1) // m) * m


def _mlp_kernel(x_ref, w1_ref, b1_ref, w2_ref, b2_ref, w3_ref, b3_ref, o_ref):
    tile_b = o_ref.shape[1]
    chunk = min(_LANE_CHUNK, tile_b)

    # Tiny weights/biases: load once per grid step, reuse across chunks.
    w1 = w1_ref[...]   # [6, 9]
    b1 = b1_ref[...]   # [6, 1]
    w2 = w2_ref[...]   # [6, 6]
    b2 = b2_ref[...]   # [6, 1]
    w3 = w3_ref[...]   # [6, 6]
    b3 = b3_ref[...]   # [6, 1]

    def linear(h, w, b):
        # h: [n_in, cw]  ->  [n_out, cw]  via VPU broadcast-MACs (no MXU).
        n_out, n_in = w.shape
        cw = h.shape[1]
        acc = jnp.broadcast_to(b, (n_out, cw)).astype(jnp.float32)
        for i in range(n_in):
            acc = acc + w[:, i:i + 1] * h[i:i + 1, :]
        return acc

    # Static inner loop over lane chunks of the batch tile.
    for c0 in range(0, tile_b, chunk):
        cw = min(chunk, tile_b - c0)
        x = x_ref[:, c0:c0 + cw]                          # [9, cw]
        h1 = jnp.maximum(linear(x, w1, b1), 0.0)           # [6, cw]
        h2 = jnp.maximum(linear(h1, w2, b2), 0.0)          # [6, cw]
        y = linear(h2, w3, b3)                             # [6, cw]
        o_ref[:, c0:c0 + cw] = y.astype(o_ref.dtype)


def train6dof_forward(x, params, max_tile_b=_MAX_TILE_B):
    """x: [B, 9] float32; params: dict of weights/biases. Returns [B, 6]."""
    B = x.shape[0]
    tile_b = min(max_tile_b, _round_up(B, 128))     # multiple of 128
    Bp = _round_up(B, tile_b)

    # Feature-major, lane-dense layout with batch padded to a tile multiple.
    x_fb = jnp.transpose(x.astype(jnp.float32))     # [9, B]
    if Bp != B:
        x_fb = jnp.pad(x_fb, ((0, 0), (0, Bp - B)))

    b1 = params["b1"].reshape(-1, 1)
    b2 = params["b2"].reshape(-1, 1)
    b3 = params["b3"].reshape(-1, 1)

    const = lambda i: (0, 0)   # weights/biases: DMA once, stay resident
    out_fb = pl.pallas_call(
        _mlp_kernel,
        out_shape=jax.ShapeDtypeStruct((6, Bp), jnp.float32),
        grid_spec=pltpu.PrefetchScalarGridSpec(
            num_scalar_prefetch=0,
            grid=(Bp // tile_b,),
            in_specs=[
                pl.BlockSpec((9, tile_b), lambda i: (0, i)),   # x tile
                pl.BlockSpec((6, 9), const),                   # w1
                pl.BlockSpec((6, 1), const),                   # b1
                pl.BlockSpec((6, 6), const),                   # w2
                pl.BlockSpec((6, 1), const),                   # b2
                pl.BlockSpec((6, 6), const),                   # w3
                pl.BlockSpec((6, 1), const),                   # b3
            ],
            out_specs=pl.BlockSpec((6, tile_b), lambda i: (0, i)),
        ),
        compiler_params=pltpu.CompilerParams(
            dimension_semantics=("parallel",),       # shard batch axis (v7x: 2 TCs)
            vmem_limit_bytes=32 * 1024 * 1024,
        ),
    )(x_fb, params["w1"], b1, params["w2"], b2, params["w3"], b3)

    return jnp.transpose(out_fb[:, :B])              # back to [B, 6]


def init_params(key):
    """Deterministic init mirroring nn.Linear default (U(-1/sqrt(fan_in), +))."""
    ks = jax.random.split(key, 6)

    def linear(kw, kb, fan_in, fan_out):
        bound = 1.0 / jnp.sqrt(float(fan_in))
        # PyTorch-native [out, in] weight layout.
        w = jax.random.uniform(kw, (fan_out, fan_in), jnp.float32, -bound, bound)
        b = jax.random.uniform(kb, (fan_out,), jnp.float32, -bound, bound)
        return w, b

    w1, b1 = linear(ks[0], ks[1], 9, 6)
    w2, b2 = linear(ks[2], ks[3], 6, 6)
    w3, b3 = linear(ks[4], ks[5], 6, 6)
    return {"w1": w1, "b1": b1, "w2": w2, "b2": b2, "w3": w3, "b3": b3}


def reference_forward(x, p):
    h = jnp.maximum(x @ p["w1"].T + p["b1"], 0.0)
    h = jnp.maximum(h @ p["w2"].T + p["b2"], 0.0)
    return h @ p["w3"].T + p["b3"]


if __name__ == "__main__":
    key = jax.random.PRNGKey(0)
    k_params, k_x = jax.random.split(key)

    params = init_params(k_params)
    B = 8
    x = jax.random.normal(k_x, (B, 9), jnp.float32)   # batch=8, in_features=9

    out = train6dof_forward(x, params)
    jax.block_until_ready(out)

    ref = reference_forward(x, params)
    assert out.shape == (B, 6)
    assert jnp.allclose(out, ref, atol=1e-5, rtol=1e-5)

    print("KERNEL_OK")
</pallas_src>

<mosaic_0001>
module attributes {stable_mosaic.version = 11 : i64} {
  func.func @_mlp_kernel(%arg0: i32, %arg1: memref<9x128xf32, #tpu.memory_space<vmem>>, %arg2: memref<6x9xf32, #tpu.memory_space<vmem>>, %arg3: memref<6x1xf32, #tpu.memory_space<vmem>>, %arg4: memref<6x6xf32, #tpu.memory_space<vmem>>, %arg5: memref<6x1xf32, #tpu.memory_space<vmem>>, %arg6: memref<6x6xf32, #tpu.memory_space<vmem>>, %arg7: memref<6x1xf32, #tpu.memory_space<vmem>>, %arg8: memref<6x128xf32, #tpu.memory_space<vmem>>) attributes {dimension_semantics = [#tpu.dimension_semantics<parallel>], iteration_bounds = array<i64: 1>, scalar_prefetch = 0 : i64, scratch_operands = 0 : i64, tpu.core_type = #tpu.core_type<tc>, window_params = [{transform_indices = @transform_0, window_bounds = array<i64: 9, 128>}, {pipeline_mode = #tpu.pipeline_mode<synchronous>, transform_indices = @transform_1, window_bounds = array<i64: 6, 9>}, {pipeline_mode = #tpu.pipeline_mode<synchronous>, transform_indices = @transform_2, window_bounds = array<i64: 6, 1>}, {pipeline_mode = #tpu.pipeline_mode<synchronous>, transform_indices = @transform_3, window_bounds = array<i64: 6, 6>}, {pipeline_mode = #tpu.pipeline_mode<synchronous>, transform_indices = @transform_4, window_bounds = array<i64: 6, 1>}, {pipeline_mode = #tpu.pipeline_mode<synchronous>, transform_indices = @transform_5, window_bounds = array<i64: 6, 6>}, {pipeline_mode = #tpu.pipeline_mode<synchronous>, transform_indices = @transform_6, window_bounds = array<i64: 6, 1>}, {transform_indices = @transform_7, window_bounds = array<i64: 6, 128>}]} {
    %c0 = arith.constant 0 : index
    %c0_0 = arith.constant 0 : index
    %0 = vector.load %arg2[%c0, %c0_0] : memref<6x9xf32, #tpu.memory_space<vmem>>, vector<6x9xf32>
    %c0_1 = arith.constant 0 : index
    %c0_2 = arith.constant 0 : index
    %1 = vector.load %arg3[%c0_1, %c0_2] : memref<6x1xf32, #tpu.memory_space<vmem>>, vector<6x1xf32>
    %c0_3 = arith.constant 0 : index
    %c0_4 = arith.constant 0 : index
    %2 = vector.load %arg4[%c0_3, %c0_4] : memref<6x6xf32, #tpu.memory_space<vmem>>, vector<6x6xf32>
    %c0_5 = arith.constant 0 : index
    %c0_6 = arith.constant 0 : index
    %3 = vector.load %arg5[%c0_5, %c0_6] : memref<6x1xf32, #tpu.memory_space<vmem>>, vector<6x1xf32>
    %c0_7 = arith.constant 0 : index
    %c0_8 = arith.constant 0 : index
    %4 = vector.load %arg6[%c0_7, %c0_8] : memref<6x6xf32, #tpu.memory_space<vmem>>, vector<6x6xf32>
    %c0_9 = arith.constant 0 : index
    %c0_10 = arith.constant 0 : index
    %5 = vector.load %arg7[%c0_9, %c0_10] : memref<6x1xf32, #tpu.memory_space<vmem>>, vector<6x1xf32>
    %c0_11 = arith.constant 0 : index
    %c0_12 = arith.constant 0 : index
    %6 = vector.load %arg1[%c0_11, %c0_12] : memref<9x128xf32, #tpu.memory_space<vmem>>, vector<9x128xf32>
    %7 = vector.shape_cast %1 : vector<6x1xf32> to vector<6x1xf32>
    %8 = vector.broadcast %7 : vector<6x1xf32> to vector<6x128xf32>
    %9 = vector.extract_strided_slice %0 {offsets = [0, 0], sizes = [6, 1], strides = [1, 1]} : vector<6x9xf32> to vector<6x1xf32>
    %10 = vector.extract_strided_slice %6 {offsets = [0, 0], sizes = [1, 128], strides = [1, 1]} : vector<9x128xf32> to vector<1x128xf32>
    %11 = vector.broadcast %9 : vector<6x1xf32> to vector<6x128xf32>
    %12 = vector.broadcast %10 : vector<1x128xf32> to vector<6x128xf32>
    %13 = arith.mulf %11, %12 : vector<6x128xf32>
    %14 = arith.addf %8, %13 : vector<6x128xf32>
    %15 = vector.extract_strided_slice %0 {offsets = [0, 1], sizes = [6, 1], strides = [1, 1]} : vector<6x9xf32> to vector<6x1xf32>
    %16 = vector.extract_strided_slice %6 {offsets = [1, 0], sizes = [1, 128], strides = [1, 1]} : vector<9x128xf32> to vector<1x128xf32>
    %17 = vector.broadcast %15 : vector<6x1xf32> to vector<6x128xf32>
    %18 = vector.broadcast %16 : vector<1x128xf32> to vector<6x128xf32>
    %19 = arith.mulf %17, %18 : vector<6x128xf32>
    %20 = arith.addf %14, %19 : vector<6x128xf32>
    %21 = vector.extract_strided_slice %0 {offsets = [0, 2], sizes = [6, 1], strides = [1, 1]} : vector<6x9xf32> to vector<6x1xf32>
    %22 = vector.extract_strided_slice %6 {offsets = [2, 0], sizes = [1, 128], strides = [1, 1]} : vector<9x128xf32> to vector<1x128xf32>
    %23 = vector.broadcast %21 : vector<6x1xf32> to vector<6x128xf32>
    %24 = vector.broadcast %22 : vector<1x128xf32> to vector<6x128xf32>
    %25 = arith.mulf %23, %24 : vector<6x128xf32>
    %26 = arith.addf %20, %25 : vector<6x128xf32>
    %27 = vector.extract_strided_slice %0 {offsets = [0, 3], sizes = [6, 1], strides = [1, 1]} : vector<6x9xf32> to vector<6x1xf32>
    %28 = vector.extract_strided_slice %6 {offsets = [3, 0], sizes = [1, 128], strides = [1, 1]} : vector<9x128xf32> to vector<1x128xf32>
    %29 = vector.broadcast %27 : vector<6x1xf32> to vector<6x128xf32>
    %30 = vector.broadcast %28 : vector<1x128xf32> to vector<6x128xf32>
    %31 = arith.mulf %29, %30 : vector<6x128xf32>
    %32 = arith.addf %26, %31 : vector<6x128xf32>
    %33 = vector.extract_strided_slice %0 {offsets = [0, 4], sizes = [6, 1], strides = [1, 1]} : vector<6x9xf32> to vector<6x1xf32>
    %34 = vector.extract_strided_slice %6 {offsets = [4, 0], sizes = [1, 128], strides = [1, 1]} : vector<9x128xf32> to vector<1x128xf32>
    %35 = vector.broadcast %33 : vector<6x1xf32> to vector<6x128xf32>
    %36 = vector.broadcast %34 : vector<1x128xf32> to vector<6x128xf32>
    %37 = arith.mulf %35, %36 : vector<6x128xf32>
    %38 = arith.addf %32, %37 : vector<6x128xf32>
    %39 = vector.extract_strided_slice %0 {offsets = [0, 5], sizes = [6, 1], strides = [1, 1]} : vector<6x9xf32> to vector<6x1xf32>
    %40 = vector.extract_strided_slice %6 {offsets = [5, 0], sizes = [1, 128], strides = [1, 1]} : vector<9x128xf32> to vector<1x128xf32>
    %41 = vector.broadcast %39 : vector<6x1xf32> to vector<6x128xf32>
    %42 = vector.broadcast %40 : vector<1x128xf32> to vector<6x128xf32>
    %43 = arith.mulf %41, %42 : vector<6x128xf32>
    %44 = arith.addf %38, %43 : vector<6x128xf32>
    %45 = vector.extract_strided_slice %0 {offsets = [0, 6], sizes = [6, 1], strides = [1, 1]} : vector<6x9xf32> to vector<6x1xf32>
    %46 = vector.extract_strided_slice %6 {offsets = [6, 0], sizes = [1, 128], strides = [1, 1]} : vector<9x128xf32> to vector<1x128xf32>
    %47 = vector.broadcast %45 : vector<6x1xf32> to vector<6x128xf32>
    %48 = vector.broadcast %46 : vector<1x128xf32> to vector<6x128xf32>
    %49 = arith.mulf %47, %48 : vector<6x128xf32>
    %50 = arith.addf %44, %49 : vector<6x128xf32>
    %51 = vector.extract_strided_slice %0 {offsets = [0, 7], sizes = [6, 1], strides = [1, 1]} : vector<6x9xf32> to vector<6x1xf32>
    %52 = vector.extract_strided_slice %6 {offsets = [7, 0], sizes = [1, 128], strides = [1, 1]} : vector<9x128xf32> to vector<1x128xf32>
    %53 = vector.broadcast %51 : vector<6x1xf32> to vector<6x128xf32>
    %54 = vector.broadcast %52 : vector<1x128xf32> to vector<6x128xf32>
    %55 = arith.mulf %53, %54 : vector<6x128xf32>
    %56 = arith.addf %50, %55 : vector<6x128xf32>
    %57 = vector.extract_strided_slice %0 {offsets = [0, 8], sizes = [6, 1], strides = [1, 1]} : vector<6x9xf32> to vector<6x1xf32>
    %58 = vector.extract_strided_slice %6 {offsets = [8, 0], sizes = [1, 128], strides = [1, 1]} : vector<9x128xf32> to vector<1x128xf32>
    %59 = vector.broadcast %57 : vector<6x1xf32> to vector<6x128xf32>
    %60 = vector.broadcast %58 : vector<1x128xf32> to vector<6x128xf32>
    %61 = arith.mulf %59, %60 : vector<6x128xf32>
    %62 = arith.addf %56, %61 : vector<6x128xf32>
    %cst = arith.constant 0.000000e+00 : f32
    %63 = vector.broadcast %cst : f32 to vector<6x128xf32>
    %64 = arith.maximumf %62, %63 : vector<6x128xf32>
    %65 = vector.shape_cast %3 : vector<6x1xf32> to vector<6x1xf32>
    %66 = vector.broadcast %65 : vector<6x1xf32> to vector<6x128xf32>
    %67 = vector.extract_strided_slice %2 {offsets = [0, 0], sizes = [6, 1], strides = [1, 1]} : vector<6x6xf32> to vector<6x1xf32>
    %68 = vector.extract_strided_slice %64 {offsets = [0, 0], sizes = [1, 128], strides = [1, 1]} : vector<6x128xf32> to vector<1x128xf32>
    %69 = vector.broadcast %67 : vector<6x1xf32> to vector<6x128xf32>
    %70 = vector.broadcast %68 : vector<1x128xf32> to vector<6x128xf32>
    %71 = arith.mulf %69, %70 : vector<6x128xf32>
    %72 = arith.addf %66, %71 : vector<6x128xf32>
    %73 = vector.extract_strided_slice %2 {offsets = [0, 1], sizes = [6, 1], strides = [1, 1]} : vector<6x6xf32> to vector<6x1xf32>
    %74 = vector.extract_strided_slice %64 {offsets = [1, 0], sizes = [1, 128], strides = [1, 1]} : vector<6x128xf32> to vector<1x128xf32>
    %75 = vector.broadcast %73 : vector<6x1xf32> to vector<6x128xf32>
    %76 = vector.broadcast %74 : vector<1x128xf32> to vector<6x128xf32>
    %77 = arith.mulf %75, %76 : vector<6x128xf32>
    %78 = arith.addf %72, %77 : vector<6x128xf32>
    %79 = vector.extract_strided_slice %2 {offsets = [0, 2], sizes = [6, 1], strides = [1, 1]} : vector<6x6xf32> to vector<6x1xf32>
    %80 = vector.extract_strided_slice %64 {offsets = [2, 0], sizes = [1, 128], strides = [1, 1]} : vector<6x128xf32> to vector<1x128xf32>
    %81 = vector.broadcast %79 : vector<6x1xf32> to vector<6x128xf32>
    %82 = vector.broadcast %80 : vector<1x128xf32> to vector<6x128xf32>
    %83 = arith.mulf %81, %82 : vector<6x128xf32>
    %84 = arith.addf %78, %83 : vector<6x128xf32>
    %85 = vector.extract_strided_slice %2 {offsets = [0, 3], sizes = [6, 1], strides = [1, 1]} : vector<6x6xf32> to vector<6x1xf32>
    %86 = vector.extract_strided_slice %64 {offsets = [3, 0], sizes = [1, 128], strides = [1, 1]} : vector<6x128xf32> to vector<1x128xf32>
    %87 = vector.broadcast %85 : vector<6x1xf32> to vector<6x128xf32>
    %88 = vector.broadcast %86 : vector<1x128xf32> to vector<6x128xf32>
    %89 = arith.mulf %87, %88 : vector<6x128xf32>
    %90 = arith.addf %84, %89 : vector<6x128xf32>
    %91 = vector.extract_strided_slice %2 {offsets = [0, 4], sizes = [6, 1], strides = [1, 1]} : vector<6x6xf32> to vector<6x1xf32>
    %92 = vector.extract_strided_slice %64 {offsets = [4, 0], sizes = [1, 128], strides = [1, 1]} : vector<6x128xf32> to vector<1x128xf32>
    %93 = vector.broadcast %91 : vector<6x1xf32> to vector<6x128xf32>
    %94 = vector.broadcast %92 : vector<1x128xf32> to vector<6x128xf32>
    %95 = arith.mulf %93, %94 : vector<6x128xf32>
    %96 = arith.addf %90, %95 : vector<6x128xf32>
    %97 = vector.extract_strided_slice %2 {offsets = [0, 5], sizes = [6, 1], strides = [1, 1]} : vector<6x6xf32> to vector<6x1xf32>
    %98 = vector.extract_strided_slice %64 {offsets = [5, 0], sizes = [1, 128], strides = [1, 1]} : vector<6x128xf32> to vector<1x128xf32>
    %99 = vector.broadcast %97 : vector<6x1xf32> to vector<6x128xf32>
    %100 = vector.broadcast %98 : vector<1x128xf32> to vector<6x128xf32>
    %101 = arith.mulf %99, %100 : vector<6x128xf32>
    %102 = arith.addf %96, %101 : vector<6x128xf32>
    %cst_13 = arith.constant 0.000000e+00 : f32
    %103 = vector.broadcast %cst_13 : f32 to vector<6x128xf32>
    %104 = arith.maximumf %102, %103 : vector<6x128xf32>
    %105 = vector.shape_cast %5 : vector<6x1xf32> to vector<6x1xf32>
    %106 = vector.broadcast %105 : vector<6x1xf32> to vector<6x128xf32>
    %107 = vector.extract_strided_slice %4 {offsets = [0, 0], sizes = [6, 1], strides = [1, 1]} : vector<6x6xf32> to vector<6x1xf32>
    %108 = vector.extract_strided_slice %104 {offsets = [0, 0], sizes = [1, 128], strides = [1, 1]} : vector<6x128xf32> to vector<1x128xf32>
    %109 = vector.broadcast %107 : vector<6x1xf32> to vector<6x128xf32>
    %110 = vector.broadcast %108 : vector<1x128xf32> to vector<6x128xf32>
    %111 = arith.mulf %109, %110 : vector<6x128xf32>
    %112 = arith.addf %106, %111 : vector<6x128xf32>
    %113 = vector.extract_strided_slice %4 {offsets = [0, 1], sizes = [6, 1], strides = [1, 1]} : vector<6x6xf32> to vector<6x1xf32>
    %114 = vector.extract_strided_slice %104 {offsets = [1, 0], sizes = [1, 128], strides = [1, 1]} : vector<6x128xf32> to vector<1x128xf32>
    %115 = vector.broadcast %113 : vector<6x1xf32> to vector<6x128xf32>
    %116 = vector.broadcast %114 : vector<1x128xf32> to vector<6x128xf32>
    %117 = arith.mulf %115, %116 : vector<6x128xf32>
    %118 = arith.addf %112, %117 : vector<6x128xf32>
    %119 = vector.extract_strided_slice %4 {offsets = [0, 2], sizes = [6, 1], strides = [1, 1]} : vector<6x6xf32> to vector<6x1xf32>
    %120 = vector.extract_strided_slice %104 {offsets = [2, 0], sizes = [1, 128], strides = [1, 1]} : vector<6x128xf32> to vector<1x128xf32>
    %121 = vector.broadcast %119 : vector<6x1xf32> to vector<6x128xf32>
    %122 = vector.broadcast %120 : vector<1x128xf32> to vector<6x128xf32>
    %123 = arith.mulf %121, %122 : vector<6x128xf32>
    %124 = arith.addf %118, %123 : vector<6x128xf32>
    %125 = vector.extract_strided_slice %4 {offsets = [0, 3], sizes = [6, 1], strides = [1, 1]} : vector<6x6xf32> to vector<6x1xf32>
    %126 = vector.extract_strided_slice %104 {offsets = [3, 0], sizes = [1, 128], strides = [1, 1]} : vector<6x128xf32> to vector<1x128xf32>
    %127 = vector.broadcast %125 : vector<6x1xf32> to vector<6x128xf32>
    %128 = vector.broadcast %126 : vector<1x128xf32> to vector<6x128xf32>
    %129 = arith.mulf %127, %128 : vector<6x128xf32>
    %130 = arith.addf %124, %129 : vector<6x128xf32>
    %131 = vector.extract_strided_slice %4 {offsets = [0, 4], sizes = [6, 1], strides = [1, 1]} : vector<6x6xf32> to vector<6x1xf32>
    %132 = vector.extract_strided_slice %104 {offsets = [4, 0], sizes = [1, 128], strides = [1, 1]} : vector<6x128xf32> to vector<1x128xf32>
    %133 = vector.broadcast %131 : vector<6x1xf32> to vector<6x128xf32>
    %134 = vector.broadcast %132 : vector<1x128xf32> to vector<6x128xf32>
    %135 = arith.mulf %133, %134 : vector<6x128xf32>
    %136 = arith.addf %130, %135 : vector<6x128xf32>
    %137 = vector.extract_strided_slice %4 {offsets = [0, 5], sizes = [6, 1], strides = [1, 1]} : vector<6x6xf32> to vector<6x1xf32>
    %138 = vector.extract_strided_slice %104 {offsets = [5, 0], sizes = [1, 128], strides = [1, 1]} : vector<6x128xf32> to vector<1x128xf32>
    %139 = vector.broadcast %137 : vector<6x1xf32> to vector<6x128xf32>
    %140 = vector.broadcast %138 : vector<1x128xf32> to vector<6x128xf32>
    %141 = arith.mulf %139, %140 : vector<6x128xf32>
    %142 = arith.addf %136, %141 : vector<6x128xf32>
    %c0_14 = arith.constant 0 : index
    %c0_15 = arith.constant 0 : index
    %143 = vector.load %arg8[%c0_14, %c0_15] : memref<6x128xf32, #tpu.memory_space<vmem>>, vector<6x128xf32>
    tpu.vector_store %arg8[%c0_14, %c0_15], %142 {strides = array<i32>} : memref<6x128xf32, #tpu.memory_space<vmem>>, vector<6x128xf32>,
    return
  }
  func.func @transform_0(%arg0: i32) -> (i32, i32) {
    %c0_i32 = arith.constant 0 : i32
    %c0_i32_0 = arith.constant 0 : i32
    return %c0_i32, %arg0 : i32, i32
  }
  func.func @transform_1(%arg0: i32) -> (i32, i32) {
    %c0_i32 = arith.constant 0 : i32
    %c0_i32_0 = arith.constant 0 : i32
    %c0_i32_1 = arith.constant 0 : i32
    return %c0_i32, %c0_i32_0 : i32, i32
  }
  func.func @transform_2(%arg0: i32) -> (i32, i32) {
    %c0_i32 = arith.constant 0 : i32
    %c0_i32_0 = arith.constant 0 : i32
    %c0_i32_1 = arith.constant 0 : i32
    return %c0_i32, %c0_i32_0 : i32, i32
  }
  func.func @transform_3(%arg0: i32) -> (i32, i32) {
    %c0_i32 = arith.constant 0 : i32
    %c0_i32_0 = arith.constant 0 : i32
    %c0_i32_1 = arith.constant 0 : i32
    return %c0_i32, %c0_i32_0 : i32, i32
  }
  func.func @transform_4(%arg0: i32) -> (i32, i32) {
    %c0_i32 = arith.constant 0 : i32
    %c0_i32_0 = arith.constant 0 : i32
    %c0_i32_1 = arith.constant 0 : i32
    return %c0_i32, %c0_i32_0 : i32, i32
  }
  func.func @transform_5(%arg0: i32) -> (i32, i32) {
    %c0_i32 = arith.constant 0 : i32
    %c0_i32_0 = arith.constant 0 : i32
    %c0_i32_1 = arith.constant 0 : i32
    return %c0_i32, %c0_i32_0 : i32, i32
  }
  func.func @transform_6(%arg0: i32) -> (i32, i32) {
    %c0_i32 = arith.constant 0 : i32
    %c0_i32_0 = arith.constant 0 : i32
    %c0_i32_1 = arith.constant 0 : i32
    return %c0_i32, %c0_i32_0 : i32, i32
  }
  func.func @transform_7(%arg0: i32) -> (i32, i32) {
    %c0_i32 = arith.constant 0 : i32
    %c0_i32_0 = arith.constant 0 : i32
    return %c0_i32, %arg0 : i32, i32
  }
}

</mosaic_0001>

<bundles_post_ra>
// kernel: tpu_custom_call.1
= control target key start
LH: loop header
LB: loop body
LE: loop exit
PB: predicated region body
PF: predicated region fallthrough
CT: control target
= control target key end

     0   :  { %v338_v1 = vmov 1   ;;  %v339_v2 = vmov 0   ;;  %s454_s0 = inlined_call_operand.vmem [shape: f32[9,128], index: 0, kind: input, shape index: {}]   ;;  %s455_s1 = inlined_call_operand.vmem [shape: f32[6,9], index: 1, kind: input, shape index: {}]   ;;  %s456_s2 = inlined_call_operand.vmem [shape: f32[6,1], index: 2, kind: input, shape index: {}]   ;;  %s457_s3 = inlined_call_operand.vmem [shape: f32[6,6], index: 3, kind: input, shape index: {}]   ;;  %s458_s4 = inlined_call_operand.vmem [shape: f32[6,1], index: 4, kind: input, shape index: {}]   ;;  %s459_s5 = inlined_call_operand.vmem [shape: f32[6,6], index: 5, kind: input, shape index: {}]   ;;  %s460_s6 = inlined_call_operand.vmem [shape: f32[6,1], index: 6, kind: input, shape index: {}]   ;;  %s461_s7 = inlined_call_operand.hbm [shape: f32[6,128], index: 7, kind: output, shape index: {}]  }
   0x1   :  { %v27_v0 = vld [vmem:[%s455_s1] sm:$0x3f]  ;;  %292 = vset.pattern.permute.xlu1 %v338_v1  ;;  %291 = vset.pattern.permute.xlu0 %v339_v2 }
   0x2   :  { %52 = vperm.xlu1 %292, %v27_v0   ;;  %42 = vperm.xlu0 %291, %v27_v0   ;;  %v28_v3 = vld [vmem:[%s456_s2] sm:$0x3f] }
   0x3   :  { %12 = vsyncpa [#allocation3], 0  ;;  %v340_v4 = vmov 2   ;;  %v341_v5 = vmov 3   ;;  %v342_v6 = vmov 4   ;;  %v343_v7 = vmov 6  }
   0x4   :  { %v344_v8 = vmov 5   ;;  %v29_v9 = vld [vmem:[%s457_s3] sm:$0x3f]  ;;  %v345_v10 = vmov 7   ;;  %v346_v11 = vmov 8   ;;  %v45_v15 = vlaneseq }
   0x5   :  { %v30_v12 = vld [vmem:[%s458_s4] sm:$0x3f]  ;;  %v280_v58 = vld [vmem:[%s454_s0 + $0x8] ss:$0 sm:$0xff] }
   0x6   :  { %293 = vset.pattern.permute.xlu1 %v340_v4  ;;  %37 = vperm.xlu0 %291, %v28_v3   ;;  %v31_v13 = vld [vmem:[%s459_s5] sm:$0x3f]  ;;  %v46_v16 = vshrl.u32 %v45_v15, 7 }
   0x7   :  { %62 = vperm.xlu1 %293, %v27_v0   ;;  %v32_v14 = vld [vmem:[%s460_s6] sm:$0x3f] }
   0x8   :  { %v406_v17 = vsub.s32 0, %v46_v16  ;;  %v33_v18 = vld [vmem:[%s454_s0] sm:$0xff]  ;;  %v411_v19 = vsub.s32 1, %v46_v16  ;;  %v414_v21 = vsub.s32 2, %v46_v16  ;;  %v418_v27 = vsub.s32 3, %v46_v16  ;;  %s347_s0 = smov [#allocation2]  }
   0x9   :  { %v420_v29 = vsub.s32 4, %v46_v16  ;;  %v424_v37 = vsub.s32 5, %v46_v16  ;;  %v107_v42 = vsub.s32 6, %v46_v16  ;;  %v117_v47 = vsub.s32 7, %v46_v16  ;;  %s272_s11 = sshll.u32 %s347_s0, 4  ;;  %s273_s11 = int_to_ptr.vmem [resolvable:$true] %s272_s11 }
   0xa   :  { %294 = vset.pattern.permute.xlu0 %v341_v5  ;;  %v48_v20 = vrot.slane %v33_v18, %v406_v17  ;;  %v58_v24 = vrot.slane %v33_v18, %v411_v19  ;;  %v68_v26 = vrot.slane %v33_v18, %v414_v21  ;;  %v78_v34 = vrot.slane %v33_v18, %v418_v27  ;;  %s314_s12 = scalar_lea.vmem %s273_s11, 128  ;;  %p319_p1 = scmp.lt.s32.totalorder %s273_s11, %s273_s11 }
   0xb   :  { %295 = vset.pattern.permute.xlu1 %v342_v6  ;;  %72 = vperm.xlu0 %294, %v27_v0   ;;  %v88_v36 = vrot.slane %v33_v18, %v420_v29  ;;  %v98_v45 = vrot.slane %v33_v18, %v424_v37  ;;  %v108_v46 = vrot.slane %v33_v18, %v107_v42  ;;  %p315_p0 = scmp.ne.s32.totalorder %s273_s11, %s314_s12  ;;  %p320_p2 = scmp.lt.s32.totalorder %s314_s12, %s314_s12 }
   0xc   :  { %82 = vperm.xlu1 %295, %v27_v0   ;;  %v118_v54 = vrot.slane %v33_v18, %v117_v47 }
   0xd   :  { %p321_p3 = por %p320_p2, %p319_p1 }
   0xf   :  { %297 = vset.pattern.permute.xlu0 %v343_v7  ;;  %p322_p4 = pnand %p321_p3, %p315_p0 }
  0x10   :  { %296 = vset.pattern.permute.xlu1 %v344_v8  ;;  %102 = vperm.xlu0 %297, %v27_v0  }
  0x11   :  { %92 = vperm.xlu1 %296, %v27_v0  }
  0x14   :  { %300 = vset.pattern.permute.xlu0 %v339_v2 }
  0x15   :  { %298 = vset.pattern.permute.xlu1 %v345_v10  ;;  %139 = vperm.xlu0 %300, %v29_v9  }
  0x16   :  { %112 = vperm.xlu1 %298, %v27_v0  }
  0x19   :  { %303 = vset.pattern.permute.xlu0 %v340_v4 }
  0x1a   :  { %299 = vset.pattern.permute.xlu1 %v346_v11  ;;  %159 = vperm.xlu0 %303, %v29_v9  }
  0x1b   :  { %122 = vperm.xlu1 %299, %v27_v0  }
  0x1e   :  { %306 = vset.pattern.permute.xlu0 %v344_v8 }
  0x1f   :  { %301 = vset.pattern.permute.xlu1 %v339_v2  ;;  %189 = vperm.xlu0 %306, %v29_v9  }
  0x20   :  { %134 = vperm.xlu1 %301, %v30_v12  }
  0x23   :  { %308 = vset.pattern.permute.xlu0 %v338_v1 }
  0x24   :  { %302 = vset.pattern.permute.xlu1 %v338_v1  ;;  %216 = vperm.xlu0 %308, %v31_v13  }
  0x25   :  { %149 = vperm.xlu1 %302, %v29_v9  }
  0x28   :  { %311 = vset.pattern.permute.xlu0 %v342_v6 }
  0x29   :  { %304 = vset.pattern.permute.xlu1 %v341_v5  ;;  %246 = vperm.xlu0 %311, %v31_v13  }
  0x2a   :  { %169 = vperm.xlu1 %304, %v29_v9  }
  0x2d   :  { %313 = vset.pattern.permute.xlu0 %v344_v8 }
  0x2e   :  { %305 = vset.pattern.permute.xlu1 %v342_v6 }
  0x2f   :  { %179 = vperm.xlu1 %305, %v29_v9  }
  0x33   :  { %307 = vset.pattern.permute.xlu1 %v339_v2 }
  0x34   :  { %206 = vperm.xlu1 %307, %v31_v13  }
  0x38   :  { %201 = vperm.xlu1 %307, %v32_v14  }
  0x3c   :  { %309 = vset.pattern.permute.xlu1 %v340_v4 }
  0x3d   :  { %226 = vperm.xlu1 %309, %v31_v13  }
  0x41   :  { %310 = vset.pattern.permute.xlu1 %v341_v5 }
  0x42   :  { %236 = vperm.xlu1 %310, %v31_v13  }
  0x46   :  { %312 = vset.pattern.permute.xlu1 %v344_v8 }
  0x47   :  { %256 = vperm.xlu1 %312, %v31_v13  }
  0x81   :  { %v53_v22 = vpop.permute.xlu1 %52  ;;  %v43_v23 = vpop.permute.xlu0 %42 }
  0x82   :  { %v49_v25 = vmul.f32 %v48_v20, %v43_v23  ;;  %v59_v30 = vmul.f32 %v58_v24, %v53_v22 }
  0x85   :  { %v38_v28 = vpop.permute.xlu0 %37 }
  0x86   :  { %v50_v31 = vadd.f32 %v49_v25, %v38_v28  ;;  %v63_v32 = vpop.permute.xlu1 %62 }
  0x87   :  { %v69_v33 = vmul.f32 %v68_v26, %v63_v32 }
  0x88   :  { %v60_v35 = vadd.f32 %v59_v30, %v50_v31 }
  0x8a   :  { %v70_v38 = vadd.f32 %v69_v33, %v60_v35  ;;  %v73_v39 = vpop.permute.xlu0 %72 }
  0x8b   :  { %v79_v40 = vmul.f32 %v78_v34, %v73_v39  ;;  %v83_v41 = vpop.permute.xlu1 %82 }
  0x8c   :  { %v89_v44 = vmul.f32 %v88_v36, %v83_v41 }
  0x8d   :  { %v80_v43 = vadd.f32 %v79_v40, %v70_v38 }
  0x8f   :  { %v103_v49 = vpop.permute.xlu0 %102  ;;  %v90_v50 = vadd.f32 %v89_v44, %v80_v43 }
  0x90   :  { %v93_v48 = vpop.permute.xlu1 %92  ;;  %v109_v53 = vmul.f32 %v108_v46, %v103_v49 }
  0x91   :  { %v99_v51 = vmul.f32 %v98_v45, %v93_v48 }
  0x93   :  { %v100_v52 = vadd.f32 %v99_v51, %v90_v50 }
  0x94   :  { %v140_v2 = vpop.permute.xlu0 %139 }
  0x95   :  { %v113_v55 = vpop.permute.xlu1 %112  ;;  %v110_v56 = vadd.f32 %v109_v53, %v100_v52 }
  0x96   :  { %v119_v57 = vmul.f32 %v118_v54, %v113_v55 }
  0x98   :  { %v120_v60 = vadd.f32 %v119_v57, %v110_v56 }
  0x99   :  { %v160_v10 = vpop.permute.xlu0 %159 }
  0x9a   :  { %v123_v59 = vpop.permute.xlu1 %122 }
  0x9b   :  { %v129_v61 = vmul.f32 %v280_v58, %v123_v59 }
  0x9d   :  { %v130_v62 = vadd.f32 %v129_v61, %v120_v60 }
  0x9e   :  { %v190_v20 = vpop.permute.xlu0 %189 }
  0x9f   :  { %v131_v63 = vmax.f32 %v130_v62, 0.0  ;;  %v135_v0 = vpop.permute.xlu1 %134 }
  0xa1   :  { %v145_v1 = vrot.slane %v131_v63, %v406_v17  ;;  %v155_v4 = vrot.slane %v131_v63, %v411_v19  ;;  %v165_v6 = vrot.slane %v131_v63, %v414_v21  ;;  %v175_v13 = vrot.slane %v131_v63, %v418_v27 }
  0xa2   :  { %v195_v16 = vrot.slane %v131_v63, %v424_v37  ;;  %v185_v18 = vrot.slane %v131_v63, %v420_v29 }
  0xa3   :  { %v146_v3 = vmul.f32 %v145_v1, %v140_v2  ;;  %v166_v11 = vmul.f32 %v165_v6, %v160_v10  ;;  %v217_v36 = vpop.permute.xlu0 %216 }
  0xa4   :  { %v150_v5 = vpop.permute.xlu1 %149  ;;  %v196_v25 = vmul.f32 %v195_v16, %v190_v20 }
  0xa5   :  { %v147_v7 = vadd.f32 %v146_v3, %v135_v0  ;;  %v156_v8 = vmul.f32 %v155_v4, %v150_v5 }
  0xa7   :  { %v157_v9 = vadd.f32 %v156_v8, %v147_v7 }
  0xa8   :  { %v247_v46 = vpop.permute.xlu0 %246 }
  0xa9   :  { %v170_v12 = vpop.permute.xlu1 %169  ;;  %v167_v14 = vadd.f32 %v166_v11, %v157_v9 }
  0xaa   :  { %v176_v15 = vmul.f32 %v175_v13, %v170_v12 }
  0xac   :  { %v177_v23 = vadd.f32 %v176_v15, %v167_v14 }
  0xae   :  { %v180_v22 = vpop.permute.xlu1 %179 }
  0xaf   :  { %v186_v24 = vmul.f32 %v185_v18, %v180_v22 }
  0xb1   :  { %v187_v26 = vadd.f32 %v186_v24, %v177_v23 }
  0xb3   :  { %v197_v28 = vadd.f32 %v196_v25, %v187_v26  ;;  %v207_v30 = vpop.permute.xlu1 %206 }
  0xb5   :  { %v198_v31 = vmax.f32 %v197_v28, 0.0 }
  0xb7   :  { %v212_v32 = vrot.slane %v198_v31, %v406_v17  ;;  %v202_v33 = vpop.permute.xlu1 %201  ;;  %v222_v34 = vrot.slane %v198_v31, %v411_v19  ;;  %v232_v41 = vrot.slane %v198_v31, %v414_v21  ;;  %v252_v44 = vrot.slane %v198_v31, %v420_v29 }
  0xb8   :  { %v242_v45 = vrot.slane %v198_v31, %v418_v27  ;;  %v262_v19 = vrot.slane %v198_v31, %v424_v37 }
  0xb9   :  { %v213_v35 = vmul.f32 %v212_v32, %v207_v30  ;;  %v223_v39 = vmul.f32 %v222_v34, %v217_v36  ;;  %v253_v49 = vmul.f32 %v252_v44, %v247_v46 }
  0xbb   :  { %v214_v38 = vadd.f32 %v213_v35, %v202_v33 }
  0xbc   :  { %v227_v40 = vpop.permute.xlu1 %226 }
  0xbd   :  { %v224_v42 = vadd.f32 %v223_v39, %v214_v38  ;;  %v233_v43 = vmul.f32 %v232_v41, %v227_v40 }
  0xbf   :  { %v234_v48 = vadd.f32 %v233_v43, %v224_v42 }
  0xc1   :  { %v237_v47 = vpop.permute.xlu1 %236 }
  0xc2   :  { %v243_v17 = vmul.f32 %v242_v45, %v237_v47 }
  0xc4   :  { %v244_v50 = vadd.f32 %v243_v17, %v234_v48 }
  0xc6   :  { %v257_v51 = vpop.permute.xlu1 %256  ;;  %v254_v52 = vadd.f32 %v253_v49, %v244_v50 }
  0xc7   :  { %v263_v53 = vmul.f32 %v262_v19, %v257_v51 }
  0xc9   :  { %v264_v21 = vadd.f32 %v263_v53, %v254_v52 }
  0xcb   :  { %265 = vst [vmem:[#allocation2] sm:$0x3f] %v264_v21 }
  0xcc   :  { %325 = shalt.err (!%p322_p4)
}
  0xcd   :  { %s326_s15 = scalar_lea.hbm %s461_s7, 128 }
  0xce   :  { %p327_p5 = scmp.ne.s32.totalorder %s461_s7, %s326_s15  ;;  %p330_p6 = scmp.lt.u32.totalorder %s326_s15, %s461_s7 }
  0xd0   :  { %p332_p7 = pnand %p330_p6, %p327_p5 }
  0xd2   :  { %335 = shalt.err (!%p332_p7)
}
  0xd3   :  { %275 = dma.vmem_to_hbm [thread:$0]  %s273_s11, 128, %s461_s7, [#allocation3]  }
  0xd4   :  { %336 = dma.done.wait [#allocation3], 128  }
  0xd5   :  { %337 = vsyncadd [#allocation3], 4294967168 }
  0xd6   :  { %279 = vsyncpa [#allocation3], 1 }

</bundles_post_ra>
